<compile_context>
chip_gen: v5e
topology: v5e:2x2
jax: 0.10.0
libtpu: 0.0.40
codegen_flags: <defaults>
</compile_context>

<pallas_src>
from functools import partial

import jax
import jax.numpy as jnp
from jax.experimental import pallas as pl
from jax.experimental.pallas import tpu as pltpu

EPS = 1e-5
LANE = 128
FUSED_MAX_ROWS = 4096        # grid-less whole-batch-in-VMEM path up to here
RESIDENT_MAX_ROWS = 131072   # bf16 h2 scratch <= 32 MiB -> fits v7x's 64 MiB VMEM
DEFAULT_TILE = 2048          # ~256 KiB x-tile; per-grid-step overhead well amortized


def _round_up(n, m):
    return ((n + m - 1) // m) * m


# -----------------------------------------------------------------------------
# Kernels
# -----------------------------------------------------------------------------
def _fused_kernel(x_ref, w1_ref, b1_ref, w2_ref, gamma_ref, beta_ref,
                  w3_ref, b3_ref, w4_ref, b4_ref, out_ref):
    """Whole batch resident in VMEM (small/medium-B path). Everything stays on-chip."""
    x = x_ref[...].astype(jnp.bfloat16)
    h1 = jnp.dot(x, w1_ref[...], preferred_element_type=jnp.float32) + b1_ref[...]
    h1 = jnp.maximum(h1, 0.0)
    # Encoder Linear #2 bias omitted: BatchNorm with batch stats cancels it exactly.
    h2 = jnp.dot(h1.astype(jnp.bfloat16), w2_ref[...],
                 preferred_element_type=jnp.float32)

    # BatchNorm1d (training-mode batch stats), single reduction pass, folded scale/shift.
    inv_n = 1.0 / h2.shape[0]
    mean = jnp.sum(h2, axis=0, keepdims=True) * inv_n
    var = jnp.maximum(jnp.sum(h2 * h2, axis=0, keepdims=True) * inv_n - mean * mean, 0.0)
    scale = gamma_ref[...] * jax.lax.rsqrt(var + EPS)
    shift = beta_ref[...] - mean * scale
    z = h2 * scale + shift

    h3 = jnp.dot(z.astype(jnp.bfloat16), w3_ref[...],
                 preferred_element_type=jnp.float32) + b3_ref[...]
    h3 = jnp.maximum(h3, 0.0)
    out = jnp.dot(h3.astype(jnp.bfloat16), w4_ref[...],
                  preferred_element_type=jnp.float32) + b4_ref[...]
    out_ref[...] = out.astype(out_ref.dtype)


def _two_phase_kernel(x_ref, w1_ref, b1_ref, w2_ref, gamma_ref, beta_ref,
                      w3_ref, b3_ref, w4_ref, b4_ref, out_ref,
                      h2_buf, sum_acc, sq_acc, *, true_rows):
    """Single pallas_call, grid=(2, T).
    Phase 0: encoder over batch tiles, h2 -> persistent bf16 VMEM scratch, stats acc.
    Phase 1: fold BN into scale/shift once, normalize + decode from the scratch."""
    phase = pl.program_id(0)
    i = pl.program_id(1)
    tb = out_ref.shape[0]
    row0 = pl.multiple_of(i * tb, tb)

    @pl.when(jnp.logical_and(phase == 0, i == 0))
    def _():
        sum_acc[...] = jnp.zeros_like(sum_acc)
        sq_acc[...] = jnp.zeros_like(sq_acc)

    @pl.when(phase == 0)
    def _():
        x = x_ref[...].astype(jnp.bfloat16)
        h1 = jnp.dot(x, w1_ref[...], preferred_element_type=jnp.float32) + b1_ref[...]
        h1 = jnp.maximum(h1, 0.0)
        h2 = jnp.dot(h1.astype(jnp.bfloat16), w2_ref[...],
                     preferred_element_type=jnp.float32)
        # Keep the intermediate on-chip (bf16) -- no HBM round-trip between phases.
        h2_buf[pl.ds(row0, tb), :] = h2.astype(jnp.bfloat16)
        # Mask rows past the true batch size out of the statistics (padded batch).
        rows = jax.lax.broadcasted_iota(jnp.int32, (tb, 1), 0) + i * tb
        h2m = jnp.where(rows < true_rows, h2, 0.0)
        sum_acc[...] += jnp.sum(h2m, axis=0, keepdims=True)
        sq_acc[...] += jnp.sum(h2m * h2m, axis=0, keepdims=True)

    @pl.when(jnp.logical_and(phase == 1, i == 0))
    def _():
        inv_n = jnp.float32(1.0 / true_rows)
        mean = sum_acc[...] * inv_n
        var = jnp.maximum(sq_acc[...] * inv_n - mean * mean, 0.0)
        scale = gamma_ref[...] * jax.lax.rsqrt(var + EPS)
        shift = beta_ref[...] - mean * scale
        # Reuse the accumulators as the folded BN scale/shift for the rest of phase 1.
        sum_acc[...] = scale
        sq_acc[...] = shift

    @pl.when(phase == 1)
    def _():
        h2 = h2_buf[pl.ds(row0, tb), :].astype(jnp.float32)
        z = h2 * sum_acc[...] + sq_acc[...]
        h3 = jnp.dot(z.astype(jnp.bfloat16), w3_ref[...],
                     preferred_element_type=jnp.float32) + b3_ref[...]
        h3 = jnp.maximum(h3, 0.0)
        out = jnp.dot(h3.astype(jnp.bfloat16), w4_ref[...],
                      preferred_element_type=jnp.float32) + b4_ref[...]
        out_ref[...] = out.astype(out_ref.dtype)


# -----------------------------------------------------------------------------
# Wrappers
# -----------------------------------------------------------------------------
def prepare_params(params):
    """One-time prep: transpose to (in, out), zero-pad only the latent dim to 128 lanes,
    cast matmul operands to bf16. Biases / gamma / beta stay f32 (BN/bias math is f32).
    Zero padding is inert: padded weight rows/cols, b1/b3, gamma, beta are all zero,
    so padded latent columns stay exactly zero through the whole network."""
    latent_dim, input_dim = params["w1"].shape
    Lp = _round_up(latent_dim, LANE)

    def pad_cols(a, cols):
        return jnp.pad(a, ((0, 0), (0, cols - a.shape[1])))

    def pad_rows(a, rows):
        return jnp.pad(a, ((0, rows - a.shape[0]), (0, 0)))

    def row_vec(v, n):
        return jnp.pad(v, (0, n - v.shape[0])).reshape(1, n).astype(jnp.float32)

    return dict(
        w1=pad_cols(params["w1"].T, Lp).astype(jnp.bfloat16),                 # (D, Lp)
        w2=pad_cols(pad_rows(params["w2"].T, Lp), Lp).astype(jnp.bfloat16),   # (Lp, Lp)
        w3=pad_cols(pad_rows(params["w3"].T, Lp), Lp).astype(jnp.bfloat16),   # (Lp, Lp)
        w4=pad_rows(params["w4"].T, Lp).astype(jnp.bfloat16),                 # (Lp, D)
        b1=row_vec(params["b1"], Lp),
        b3=row_vec(params["b3"], Lp),
        b4=params["b4"].reshape(1, -1).astype(jnp.float32),
        gamma=row_vec(params["gamma"], Lp),   # zero-padded -> padded BN cols get scale=0
        beta=row_vec(params["beta"], Lp),
        # b2 intentionally omitted: BatchNorm with batch statistics cancels it exactly.
    )


def _forward_fused(x, prep):
    B, input_dim = x.shape
    vmem = pl.BlockSpec(memory_space=pltpu.MemorySpace.VMEM)
    return pl.pallas_call(
        _fused_kernel,
        out_shape=jax.ShapeDtypeStruct((B, input_dim), jnp.float32),
        in_specs=[vmem] * 10,
        out_specs=vmem,
        compiler_params=pltpu.CompilerParams(vmem_limit_bytes=48 * 1024 * 1024),
    )(x, prep["w1"], prep["b1"], prep["w2"], prep["gamma"], prep["beta"],
      prep["w3"], prep["b3"], prep["w4"], prep["b4"])


def _forward_two_phase(x, prep, tb):
    B, input_dim = x.shape
    Lp = prep["w2"].shape[0]
    B_pad = _round_up(B, tb)
    if B_pad != B:
        x = jnp.pad(x, ((0, B_pad - B), (0, 0)))
    num_tiles = B_pad // tb

    const = lambda p, i: (0, 0)
    h2_bytes = B_pad * Lp * 2
    vmem_limit = int(min(h2_bytes + 24 * 1024 * 1024, 100 * 1024 * 1024))

    out = pl.pallas_call(
        partial(_two_phase_kernel, true_rows=B),
        out_shape=jax.ShapeDtypeStruct((B_pad, input_dim), jnp.float32),
        grid=(2, num_tiles),
        in_specs=[
            # x only consumed in phase 0; constant index in phase 1 avoids re-DMA.
            pl.BlockSpec((tb, input_dim), lambda p, i: ((1 - p) * i, 0)),
            pl.BlockSpec((input_dim, Lp), const),
            pl.BlockSpec((1, Lp), const),
            pl.BlockSpec((Lp, Lp), const),
            pl.BlockSpec((1, Lp), const),
            pl.BlockSpec((1, Lp), const),
            pl.BlockSpec((Lp, Lp), const),
            pl.BlockSpec((1, Lp), const),
            pl.BlockSpec((Lp, input_dim), const),
            pl.BlockSpec((1, input_dim), const),
        ],
        # Block index pinned to 0 during phase 0 (never flushed there); marches and is
        # written exactly once per tile during phase 1.
        out_specs=pl.BlockSpec((tb, input_dim), lambda p, i: (p * i, 0)),
        scratch_shapes=[pltpu.VMEM((B_pad, Lp), jnp.bfloat16),   # resident h2
                        pltpu.VMEM((1, Lp), jnp.float32),        # sum  -> BN scale
                        pltpu.VMEM((1, Lp), jnp.float32)],       # sumsq-> BN shift
        compiler_params=pltpu.CompilerParams(
            dimension_semantics=("arbitrary", "arbitrary"),
            vmem_limit_bytes=vmem_limit),
    )(x, prep["w1"], prep["b1"], prep["w2"], prep["gamma"], prep["beta"],
      prep["w3"], prep["b3"], prep["w4"], prep["b4"])
    if B_pad != B:
        out = out[:B]
    return out


def _jnp_fallback(x, prep):
    h1 = jnp.maximum(x @ prep["w1"].astype(jnp.float32) + prep["b1"], 0.0)
    h2 = h1 @ prep["w2"].astype(jnp.float32)
    mean = jnp.mean(h2, axis=0, keepdims=True)
    var = jnp.maximum(jnp.mean(h2 * h2, axis=0, keepdims=True) - mean * mean, 0.0)
    z = (h2 - mean) * (prep["gamma"] * jax.lax.rsqrt(var + EPS)) + prep["beta"]
    h3 = jnp.maximum(z @ prep["w3"].astype(jnp.float32) + prep["b3"], 0.0)
    return h3 @ prep["w4"].astype(jnp.float32) + prep["b4"]


@partial(jax.jit, static_argnames=("batch_tile",))
def autoencoder_forward(x, prep, batch_tile=None):
    """x: (B, input_dim); prep: output of prepare_params(). Returns (B, input_dim) f32."""
    x = x.astype(jnp.float32)
    B = x.shape[0]

    if batch_tile is None:
        if B <= FUSED_MAX_ROWS:
            return _forward_fused(x, prep)          # tiny problems: fixed-overhead bound
        batch_tile = DEFAULT_TILE
    assert batch_tile % 16 == 0, "batch_tile must be a multiple of 16"

    if _round_up(B, batch_tile) > RESIDENT_MAX_ROWS:
        # TODO(synk): chunk the resident bf16 h2 scratch (or spill it to HBM in bf16)
        # for batches beyond ~128k rows; pure-JAX fallback keeps exact semantics here.
        return _jnp_fallback(x, prep)

    return _forward_two_phase(x, prep, batch_tile)


# -----------------------------------------------------------------------------
# Init + reference
# -----------------------------------------------------------------------------
def init_params(key, input_dim, latent_dim):
    """Deterministic PyTorch-style Linear init: U(-1/sqrt(fan_in), 1/sqrt(fan_in))."""
    ks = jax.random.split(key, 8)

    def linear(kw, kb, fan_in, fan_out):
        bound = 1.0 / jnp.sqrt(fan_in)
        w = jax.random.uniform(kw, (fan_out, fan_in), jnp.float32, -bound, bound)
        b = jax.random.uniform(kb, (fan_out,), jnp.float32, -bound, bound)
        return w, b

    w1, b1 = linear(ks[0], ks[1], input_dim, latent_dim)
    w2, b2 = linear(ks[2], ks[3], latent_dim, latent_dim)
    w3, b3 = linear(ks[4], ks[5], latent_dim, latent_dim)
    w4, b4 = linear(ks[6], ks[7], latent_dim, input_dim)
    return dict(
        w1=w1, b1=b1, w2=w2, b2=b2,
        gamma=jnp.ones((latent_dim,), jnp.float32),
        beta=jnp.zeros((latent_dim,), jnp.float32),
        w3=w3, b3=b3, w4=w4, b4=b4,
    )


def reference_forward(x, p):
    """Pure-JAX reference (full PyTorch semantics incl. b2) with the same bf16
    matmul-operand quantization as the kernel (f32 accumulation)."""
    def q(a):
        return a.astype(jnp.bfloat16).astype(jnp.float32)

    def mm(a, w):
        return jnp.dot(q(a), q(w).T, precision=jax.lax.Precision.HIGHEST)

    h1 = jnp.maximum(mm(x, p["w1"]) + p["b1"], 0.0)
    h2 = mm(h1, p["w2"]) + p["b2"]
    mean = jnp.mean(h2, axis=0, keepdims=True)
    var = jnp.mean((h2 - mean) ** 2, axis=0, keepdims=True)
    z = (h2 - mean) / jnp.sqrt(var + EPS) * p["gamma"] + p["beta"]
    h3 = jnp.maximum(mm(z, p["w3"]) + p["b3"], 0.0)
    return mm(h3, p["w4"]) + p["b4"]


# -----------------------------------------------------------------------------
# Main
# -----------------------------------------------------------------------------
if __name__ == "__main__":
    input_dim, latent_dim = 32, 16

    key = jax.random.PRNGKey(0)
    k_x1, k_x2, k_p = jax.random.split(key, 3)
    params = init_params(k_p, input_dim, latent_dim)
    prep = prepare_params(params)   # one-time weight prep (hoisted out of forward)

    # Small batch: single fused grid-less kernel.
    x_small = jax.random.normal(k_x1, (8, input_dim), jnp.float32)
    out_small = jax.block_until_ready(autoencoder_forward(x_small, prep))
    ref_small = reference_forward(x_small, params)
    assert out_small.shape == (8, input_dim)
    assert jnp.allclose(out_small, ref_small, atol=5e-3, rtol=5e-3), \
        "fused path mismatch vs JAX reference"

    # Forced two-phase resident-h2 path; non-divisible batch exercises row masking
    # (B=200, tile=64 -> padded to 256, 4 tiles, full-batch BN stats over true 200 rows).
    x_big = jax.random.normal(k_x2, (200, input_dim), jnp.float32)
    out_big = jax.block_until_ready(autoencoder_forward(x_big, prep, batch_tile=64))
    ref_big = reference_forward(x_big, params)
    assert out_big.shape == (200, input_dim)
    assert jnp.allclose(out_big, ref_big, atol=1e-2, rtol=1e-2), \
        "two-phase path mismatch vs JAX reference"

    print("KERNEL_OK")
</pallas_src>

<mosaic_0001>
module attributes {stable_mosaic.version = 11 : i64} {
  func.func @_fused_kernel(%arg0: memref<8x32xf32, #tpu.memory_space<vmem>>, %arg1: memref<32x128xbf16, #tpu.memory_space<vmem>>, %arg2: memref<1x128xf32, #tpu.memory_space<vmem>>, %arg3: memref<128x128xbf16, #tpu.memory_space<vmem>>, %arg4: memref<1x128xf32, #tpu.memory_space<vmem>>, %arg5: memref<1x128xf32, #tpu.memory_space<vmem>>, %arg6: memref<128x128xbf16, #tpu.memory_space<vmem>>, %arg7: memref<1x128xf32, #tpu.memory_space<vmem>>, %arg8: memref<128x32xbf16, #tpu.memory_space<vmem>>, %arg9: memref<1x32xf32, #tpu.memory_space<vmem>>, %arg10: memref<8x32xf32, #tpu.memory_space<vmem>>) attributes {dimension_semantics = [], scalar_prefetch = 0 : i64, scratch_operands = 0 : i64, tpu.core_type = #tpu.core_type<tc>} {
    %c0 = arith.constant 0 : index
    %c0_0 = arith.constant 0 : index
    %0 = vector.load %arg0[%c0, %c0_0] : memref<8x32xf32, #tpu.memory_space<vmem>>, vector<8x32xf32>
    %1 = arith.truncf %0 : vector<8x32xf32> to vector<8x32xbf16>
    %c0_1 = arith.constant 0 : index
    %c0_2 = arith.constant 0 : index
    %2 = vector.load %arg1[%c0_1, %c0_2] : memref<32x128xbf16, #tpu.memory_space<vmem>>, vector<32x128xbf16>
    %cst = arith.constant dense<0.000000e+00> : vector<8x128xf32>
    %3 = tpu.matmul %1, %2, %cst {dimension_numbers = #tpu.dot_dimension_numbers<[1], [0], [0], [1], [0, 0, 1, 1], [], []>} : vector<8x32xbf16>, vector<32x128xbf16>, vector<8x128xf32> -> vector<8x128xf32>
    %c0_3 = arith.constant 0 : index
    %c0_4 = arith.constant 0 : index
    %4 = vector.load %arg2[%c0_3, %c0_4] : memref<1x128xf32, #tpu.memory_space<vmem>>, vector<1x128xf32>
    %5 = vector.broadcast %4 : vector<1x128xf32> to vector<8x128xf32>
    %6 = arith.addf %3, %5 : vector<8x128xf32>
    %cst_5 = arith.constant 0.000000e+00 : f32
    %7 = vector.broadcast %cst_5 : f32 to vector<8x128xf32>
    %8 = arith.maximumf %6, %7 : vector<8x128xf32>
    %9 = arith.truncf %8 : vector<8x128xf32> to vector<8x128xbf16>
    %c0_6 = arith.constant 0 : index
    %c0_7 = arith.constant 0 : index
    %10 = vector.load %arg3[%c0_6, %c0_7] : memref<128x128xbf16, #tpu.memory_space<vmem>>, vector<128x128xbf16>
    %cst_8 = arith.constant dense<0.000000e+00> : vector<8x128xf32>
    %11 = tpu.matmul %9, %10, %cst_8 {dimension_numbers = #tpu.dot_dimension_numbers<[1], [0], [0], [1], [0, 0, 1, 1], [], []>} : vector<8x128xbf16>, vector<128x128xbf16>, vector<8x128xf32> -> vector<8x128xf32>
    %cst_9 = arith.constant dense<0.000000e+00> : vector<128xf32>
    %12 = vector.multi_reduction <add>, %11, %cst_9 [0] : vector<8x128xf32> to vector<128xf32>
    %13 = vector.shape_cast %12 : vector<128xf32> to vector<1x128xf32>
    %cst_10 = arith.constant 1.250000e-01 : f32
    %14 = vector.broadcast %cst_10 : f32 to vector<1x128xf32>
    %15 = arith.mulf %13, %14 : vector<1x128xf32>
    %16 = arith.mulf %11, %11 : vector<8x128xf32>
    %cst_11 = arith.constant dense<0.000000e+00> : vector<128xf32>
    %17 = vector.multi_reduction <add>, %16, %cst_11 [0] : vector<8x128xf32> to vector<128xf32>
    %18 = vector.shape_cast %17 : vector<128xf32> to vector<1x128xf32>
    %cst_12 = arith.constant 1.250000e-01 : f32
    %19 = vector.broadcast %cst_12 : f32 to vector<1x128xf32>
    %20 = arith.mulf %18, %19 : vector<1x128xf32>
    %21 = arith.mulf %15, %15 : vector<1x128xf32>
    %22 = arith.subf %20, %21 : vector<1x128xf32>
    %cst_13 = arith.constant 0.000000e+00 : f32
    %23 = vector.broadcast %cst_13 : f32 to vector<1x128xf32>
    %24 = arith.maximumf %22, %23 : vector<1x128xf32>
    %c0_14 = arith.constant 0 : index
    %c0_15 = arith.constant 0 : index
    %25 = vector.load %arg4[%c0_14, %c0_15] : memref<1x128xf32, #tpu.memory_space<vmem>>, vector<1x128xf32>
    %cst_16 = arith.constant 9.99999974E-6 : f32
    %26 = vector.broadcast %cst_16 : f32 to vector<1x128xf32>
    %27 = arith.addf %24, %26 : vector<1x128xf32>
    %28 = math.rsqrt %27 : vector<1x128xf32>
    %29 = arith.mulf %25, %28 : vector<1x128xf32>
    %c0_17 = arith.constant 0 : index
    %c0_18 = arith.constant 0 : index
    %30 = vector.load %arg5[%c0_17, %c0_18] : memref<1x128xf32, #tpu.memory_space<vmem>>, vector<1x128xf32>
    %31 = arith.mulf %15, %29 : vector<1x128xf32>
    %32 = arith.subf %30, %31 : vector<1x128xf32>
    %33 = vector.broadcast %29 : vector<1x128xf32> to vector<8x128xf32>
    %34 = arith.mulf %11, %33 : vector<8x128xf32>
    %35 = vector.broadcast %32 : vector<1x128xf32> to vector<8x128xf32>
    %36 = arith.addf %34, %35 : vector<8x128xf32>
    %37 = arith.truncf %36 : vector<8x128xf32> to vector<8x128xbf16>
    %c0_19 = arith.constant 0 : index
    %c0_20 = arith.constant 0 : index
    %38 = vector.load %arg6[%c0_19, %c0_20] : memref<128x128xbf16, #tpu.memory_space<vmem>>, vector<128x128xbf16>
    %cst_21 = arith.constant dense<0.000000e+00> : vector<8x128xf32>
    %39 = tpu.matmul %37, %38, %cst_21 {dimension_numbers = #tpu.dot_dimension_numbers<[1], [0], [0], [1], [0, 0, 1, 1], [], []>} : vector<8x128xbf16>, vector<128x128xbf16>, vector<8x128xf32> -> vector<8x128xf32>
    %c0_22 = arith.constant 0 : index
    %c0_23 = arith.constant 0 : index
    %40 = vector.load %arg7[%c0_22, %c0_23] : memref<1x128xf32, #tpu.memory_space<vmem>>, vector<1x128xf32>
    %41 = vector.broadcast %40 : vector<1x128xf32> to vector<8x128xf32>
    %42 = arith.addf %39, %41 : vector<8x128xf32>
    %cst_24 = arith.constant 0.000000e+00 : f32
    %43 = vector.broadcast %cst_24 : f32 to vector<8x128xf32>
    %44 = arith.maximumf %42, %43 : vector<8x128xf32>
    %45 = arith.truncf %44 : vector<8x128xf32> to vector<8x128xbf16>
    %c0_25 = arith.constant 0 : index
    %c0_26 = arith.constant 0 : index
    %46 = vector.load %arg8[%c0_25, %c0_26] : memref<128x32xbf16, #tpu.memory_space<vmem>>, vector<128x32xbf16>
    %cst_27 = arith.constant dense<0.000000e+00> : vector<8x32xf32>
    %47 = tpu.matmul %45, %46, %cst_27 {dimension_numbers = #tpu.dot_dimension_numbers<[1], [0], [0], [1], [0, 0, 1, 1], [], []>} : vector<8x128xbf16>, vector<128x32xbf16>, vector<8x32xf32> -> vector<8x32xf32>
    %c0_28 = arith.constant 0 : index
    %c0_29 = arith.constant 0 : index
    %48 = vector.load %arg9[%c0_28, %c0_29] : memref<1x32xf32, #tpu.memory_space<vmem>>, vector<1x32xf32>
    %49 = vector.broadcast %48 : vector<1x32xf32> to vector<8x32xf32>
    %50 = arith.addf %47, %49 : vector<8x32xf32>
    %c0_30 = arith.constant 0 : index
    %c0_31 = arith.constant 0 : index
    %51 = vector.load %arg10[%c0_30, %c0_31] : memref<8x32xf32, #tpu.memory_space<vmem>>, vector<8x32xf32>
    tpu.vector_store %arg10[%c0_30, %c0_31], %50 {strides = array<i32>} : memref<8x32xf32, #tpu.memory_space<vmem>>, vector<8x32xf32>,
    return
  }
}

</mosaic_0001>

<bundles_post_ra>
// kernel: autoencoder_forward.1
= control target key start
LH: loop header
LB: loop body
LE: loop exit
PB: predicated region body
PF: predicated region fallthrough
CT: control target
= control target key end

     0   :  { %15 = vsyncpa [#allocation3], 0  ;;  %s770_s0 = inlined_call_operand.hbm [shape: f32[8,32], index: 0, kind: input, shape index: {}]   ;;  %s771_s1 = inlined_call_operand.vmem [shape: bf16[32,128], index: 1, kind: input, shape index: {}]   ;;  %s772_s2 = inlined_call_operand.vmem [shape: f32[1,128], index: 2, kind: input, shape index: {}]   ;;  %s773_s3 = inlined_call_operand.vmem [shape: bf16[128,128], index: 3, kind: input, shape index: {}]   ;;  %s774_s4 = inlined_call_operand.vmem [shape: f32[1,128], index: 4, kind: input, shape index: {}]   ;;  %s775_s5 = inlined_call_operand.vmem [shape: f32[1,128], index: 5, kind: input, shape index: {}]   ;;  %s776_s6 = inlined_call_operand.hbm [shape: bf16[128,128], index: 6, kind: input, shape index: {}]   ;;  %s777_s7 = inlined_call_operand.vmem [shape: f32[1,128], index: 7, kind: input, shape index: {}]   ;;  %s778_s8 = inlined_call_operand.vmem [shape: bf16[128,32], index: 8, kind: input, shape index: {}]   ;;  %s779_s9 = inlined_call_operand.vmem [shape: f32[1,32], index: 9, kind: input, shape index: {}]   ;;  %s780_s10 = inlined_call_operand.hbm [shape: f32[8,32], index: 10, kind: output, shape index: {}]  }
   0x1   :  { %16 = vsyncpa [#allocation6], 0 }
   0x2   :  { %17 = vsyncpa [#allocation4], 0  ;;  %s23_s15 = sshll.u32 %s770_s0, 4  ;;  %s630_s16 = smov [#allocation2]   ;;  %s24_s15 = int_to_ptr.hbm [resolvable:$true] %s23_s15 }
   0x3   :  { %s25_s17 = sshll.u32 %s630_s16, 4  ;;  %s43_s20 = sshll.u32 %s776_s6, 4  ;;  %s26_s17 = int_to_ptr.vmem [resolvable:$true] %s25_s17  ;;  %s44_s20 = int_to_ptr.hbm [resolvable:$true] %s43_s20 }
   0x4   :  { %28 = dma.hbm_to_vmem [thread:$0]  %s24_s15, 128, %s26_s17, [#allocation3]  }
   0x5   :  { %s631_s21 = smov [#allocation5]   ;;  %s632_s23 = smov 64  }
   0x6   :  { %s45_s22 = sshll.u32 %s631_s21, 4  ;;  %s633_s24 = smov 4   ;;  %s46_s22 = int_to_ptr.vmem [resolvable:$true] %s45_s22 }
   0x7   :  { %51 = dma.hbm_to_vmem [thread:$0]  %s44_s20, 1024, %s46_s22, [#allocation6], %s632_s23, %s632_s23, %s633_s24  }
   0x8   :  { %624 = dma.done.wait [#allocation3], 128  }
   0x9   :  { %625 = vsyncadd [#allocation3], 4294967168 }
   0xa   :  { %626 = dma.done.wait [#allocation6], 1024  }
   0xb   :  { %627 = vsyncadd [#allocation6], 4294966272  ;;  %v517_v0 = vld [vmem:[%s771_s1 + $0x8] sm:$0xff]  ;;  %v525_v1 = vld [vmem:[%s773_s3 + $0x38] sm:$0xff]  ;;  %vm89_vm0 = vcmask 261120   ;;  %s634_s21 = smov [#allocation7]  }
   0xc   :  { %99 = vmatpush.bf16.msra.mxu0 %v517_v0  ;;  %v516_v2 = vld [vmem:[%s771_s1] sm:$0xff]  ;;  %172 = vmatpush.bf16.msra.mxu1 %v525_v1  ;;  %v524_v4 = vld [vmem:[%s773_s3 + $0x30] sm:$0xff]  ;;  %v523_v6 = vld [vmem:[%s773_s3 + $0x28] sm:$0xff]  ;;  %s398_s22 = sshll.u32 %s634_s21, 4  ;;  %s399_s22 = int_to_ptr.vmem [resolvable:$true] %s398_s22 }
   0xd   :  { %v67_v3 = vld [vmem:[#allocation2] sm:$0xff]  ;;  %v521_v8 = vld [vmem:[%s773_s3 + $0x18] sm:$0xff]  ;;  %v520_v9 = vld [vmem:[%s773_s3 + $0x10] sm:$0xff] }
   0xe   :  { %v68_v5 = vpack.c.bf16 %v67_v3, %v67_v3  ;;  %v522_v7 = vld [vmem:[%s773_s3 + $0x20] sm:$0xff]  ;;  %v519_v10 = vld [vmem:[%s773_s3 + $0x8] sm:$0xff]  ;;  %v532_v19 = vld [vmem:[#allocation5 + $0x30] sm:$0xff] }
   0xf   :  { %v518_v11 = vld [vmem:[%s773_s3] sm:$0xff]  ;;  %v531_v20 = vld [vmem:[#allocation5 + $0x28] sm:$0xff]  ;;  %v530_v21 = vld [vmem:[#allocation5 + $0x20] sm:$0xff] }
  0x10   :  { %100 = vmatpush.bf16.msra.mxu0 %v516_v2  ;;  %173 = vmatpush.bf16.msra.mxu1 %v524_v4  ;;  %v547_v12 = vld [vmem:[%s772_s2] ss:$0 sm:$0xff]  ;;  %v528_v26 = vld [vmem:[#allocation5 + $0x10] sm:$0xff]  ;;  %v527_v31 = vld [vmem:[#allocation5 + $0x8] sm:$0xff] }
  0x11   :  { %v533_v18 = vld [vmem:[#allocation5 + $0x38] sm:$0xff]  ;;  %v526_v37 = vld [vmem:[#allocation5] sm:$0xff]  ;;  %v541_v47 = vld [vmem:[%s778_s8 + $0x38] sm:$0xff] }
  0x12   :  { %296 = vmatpush.bf16.msra.mxu2 %v533_v18  ;;  %v529_v22 = vld [vmem:[#allocation5 + $0x18] sm:$0xff]  ;;  %379 = vmatpush.bf16.msra.mxu3 %v541_v47  ;;  %v540_v48 = vld [vmem:[%s778_s8 + $0x30] sm:$0xff]  ;;  %v539_v49 = vld [vmem:[%s778_s8 + $0x28] sm:$0xff] }
  0x13   :  { %419 = vmatmul.msk.bf16.vlgmr.msra.gmra.mxu0 %vm89_vm0, %v68_v5  ;;  %v538_v52 = vld [vmem:[%s778_s8 + $0x20] sm:$0xff]  ;;  %v537_v55 = vld [vmem:[%s778_s8 + $0x18] sm:$0xff]  ;;  %v536_v59 = vld [vmem:[%s778_s8 + $0x10] sm:$0xff] }
  0x14   :  { %174 = vmatpush.bf16.msra.mxu1 %v523_v6  ;;  %v203_v57 = vld [vmem:[%s774_s4] sm:$0x1]  ;;  %v535_v6 = vld [vmem:[%s778_s8 + $0x8] sm:$0xff] }
  0x15   :  { %v216_v62 = vld [vmem:[%s775_s5] sm:$0x1] }
  0x16   :  { %297 = vmatpush.bf16.msra.mxu2 %v532_v19  ;;  %380 = vmatpush.bf16.msra.mxu3 %v540_v48 }
  0x18   :  { %175 = vmatpush.bf16.msra.mxu1 %v522_v7  ;;  %v534_v7 = vld [vmem:[%s778_s8] sm:$0xff]  ;;  %s400_s8 = sshll.u32 %s780_s10, 4  ;;  %s401_s8 = int_to_ptr.hbm [resolvable:$true] %s400_s8 }
  0x1a   :  { %298 = vmatpush.bf16.msra.mxu2 %v531_v20  ;;  %381 = vmatpush.bf16.msra.mxu3 %v539_v49 }
  0x1c   :  { %176 = vmatpush.bf16.msra.mxu1 %v521_v8  ;;  %v548_v8 = vld [vmem:[%s777_s7] ss:$0 sm:$0xff] }
  0x1e   :  { %299 = vmatpush.bf16.msra.mxu2 %v530_v21  ;;  %382 = vmatpush.bf16.msra.mxu3 %v538_v52 }
  0x20   :  { %177 = vmatpush.bf16.msra.mxu1 %v520_v9 }
  0x22   :  { %300 = vmatpush.bf16.msra.mxu2 %v529_v22  ;;  %383 = vmatpush.bf16.msra.mxu3 %v537_v55 }
  0x24   :  { %178 = vmatpush.bf16.msra.mxu1 %v519_v10 }
  0x26   :  { %301 = vmatpush.bf16.msra.mxu2 %v528_v26  ;;  %384 = vmatpush.bf16.msra.mxu3 %v536_v59 }
  0x28   :  { %179 = vmatpush.bf16.msra.mxu1 %v518_v11 }
  0x2a   :  { %302 = vmatpush.bf16.msra.mxu2 %v527_v31  ;;  %385 = vmatpush.bf16.msra.mxu3 %v535_v6 }
  0x2e   :  { %303 = vmatpush.bf16.msra.mxu2 %v526_v37  ;;  %386 = vmatpush.bf16.msra.mxu3 %v534_v7 }
  0x90   :  { %v102_v13 = vpop.f32.mrf.mxu0 }
  0x91   :  { %v103_v14 = vadd.f32 %v547_v12, %v102_v13 }
  0x93   :  { %v106_v15 = vmax.f32 %v103_v14, 0.0  ;;  %v549_v14 = vld [vmem:[%s779_s9] ss:$0 sm:$0xff] }
  0x95   :  { %v107_v16 = vpack.c.bf16 %v106_v15, %v106_v15 }
  0x97   :  { %180 = vmatmul.bf16.vlgmr.msra.gmra.mxu1 %v107_v16 }
  0x98   :  { %v104_v17 = vpop.f32.mrf.mxu0 }
 0x114   :  { %v181_v23 = vpop.f32.mrf.mxu1 }
 0x115   :  { %v185_v24 = vrot.slane %v181_v23, 4  ;;  %v192_v25 = vmul.f32 %v181_v23, %v181_v23 }
 0x117   :  { %v186_v27 = vadd.f32 %v185_v24, %v181_v23  ;;  %v193_v28 = vrot.slane %v192_v25, 4 }
 0x119   :  { %v187_v29 = vrot.slane %v186_v27, 2  ;;  %v194_v30 = vadd.f32 %v193_v28, %v192_v25 }
 0x11b   :  { %v188_v32 = vadd.f32 %v187_v29, %v186_v27  ;;  %v195_v33 = vrot.slane %v194_v30, 2 }
 0x11c   :  { %v183_v34 = vpop.f32.mrf.mxu1 }
 0x11d   :  { %v189_v35 = vrot.slane %v188_v32, 1  ;;  %v196_v36 = vadd.f32 %v195_v33, %v194_v30 }
 0x11f   :  { %v197_v38 = vrot.slane %v196_v36, 1  ;;  %v190_v39 = vadd.f32 %v189_v35, %v188_v32 }
 0x121   :  { %v198_v40 = vadd.f32 %v197_v38, %v196_v36  ;;  %v191_v41 = vmul.f32 0.125, %v190_v39 }
 0x123   :  { %v199_v42 = vmul.f32 0.125, %v198_v40  ;;  %v200_v43 = vmul.f32 %v191_v41, %v191_v41 }
 0x125   :  { %v201_v44 = vsub.f32 %v199_v42, %v200_v43 }
 0x127   :  { %v202_v45 = vmax.f32 %v201_v44, 0.0 }
 0x129   :  { %v204_v46 = vadd.f32 1e-05, %v202_v45 }
 0x12b   :  { %550 = vrsqrt.f32 %v204_v46  ;;  %vm211_vm2 = vweird.f32 %v204_v46 }
 0x131   :  { %v551_v50 = vpop.eup %550 }
 0x132   :  { %v206_v51 = vmul.f32 %v551_v50, %v204_v46  ;;  %vm212_vm1 = vweird.f32 %v551_v50 }
 0x133   :  { %vm213_vm3 = vmor %vm211_vm2, %vm212_vm1 }
 0x134   :  { %v207_v53 = vmul.f32 %v551_v50, %v206_v51 }
 0x136   :  { %v208_v54 = vmul.f32 0.5, %v207_v53 }
 0x138   :  { %v209_v56 = vsub.f32 1.5, %v208_v54 }
 0x13a   :  { %v210_v58 = vmul.f32 %v551_v50, %v209_v56 }
 0x13c   :  { %v214_v60 = vsel %vm213_vm3, %v551_v50, %v210_v58 }
 0x13d   :  { %v215_v61 = vmul.f32 %v214_v60, %v203_v57 }
 0x13f   :  { %v217_v63 = vmul.f32 %v215_v61, %v191_v41  ;;  %v220_v0 = vperm.slane %v215_v61, 0 }
 0x141   :  { %v218_v1 = vsub.f32 %v216_v62, %v217_v63  ;;  %v222_v2 = vmul.f32 %v220_v0, %v181_v23 }
 0x143   :  { %v224_v3 = vperm.slane %v218_v1, 0 }
 0x145   :  { %v226_v4 = vadd.f32 %v224_v3, %v222_v2 }
 0x147   :  { %v227_v5 = vpack.c.bf16 %v226_v4, %v226_v4 }
 0x149   :  { %304 = vmatmul.bf16.vlgmr.msra.gmra.mxu2 %v227_v5 }
 0x1cc   :  { %v305_v9 = vpop.f32.mrf.mxu2 }
 0x1cd   :  { %v306_v10 = vadd.f32 %v548_v8, %v305_v9 }
 0x1cf   :  { %v309_v11 = vmax.f32 %v306_v10, 0.0 }
 0x1d1   :  { %v310_v12 = vpack.c.bf16 %v309_v11, %v309_v11 }
 0x1d3   :  { %387 = vmatmul.bf16.vlgmr.msra.gmra.mxu3 %v310_v12 }
 0x1d4   :  { %v307_v13 = vpop.f32.mrf.mxu2 }
 0x256   :  { %v388_v15 = vpop.f32.mrf.mxu3 }
 0x257   :  { %v389_v16 = vadd.f32 %v549_v14, %v388_v15 }
 0x259   :  { %392 = vst.msk [vmem:[#allocation7] sm:$0xff] %vm89_vm0, %v389_v16 }
 0x25a   :  { %403 = dma.vmem_to_hbm [thread:$0]  %s399_s22, 128, %s401_s8, [#allocation4]  }
 0x25e   :  { %v390_v17 = vpop.f32.mrf.mxu3 }
 0x25f   :  { %628 = dma.done.wait [#allocation4], 128  }
 0x260   :  { %629 = vsyncadd [#allocation4], 4294967168 }
 0x261   :  { %408 = vsyncpa [#allocation3], 1 }
 0x262   :  { %409 = vsyncpa [#allocation6], 1 }
 0x263   :  { %410 = vsyncpa [#allocation4], 1 }

</bundles_post_ra>
